<compile_context>
chip_gen: v7x
topology: tpu7x:2x2x1
jax: 0.10.0
libtpu: 0.0.40
codegen_flags: <defaults>
</compile_context>

<pallas_src>
import math
import functools
import numpy as np

import jax
import jax.numpy as jnp
from jax.experimental import pallas as pl
from jax.experimental.pallas import tpu as pltpu

# ----------------------------- configuration --------------------------------
H = 32            # hidden_size
S = 8             # seq_len
B = 2             # batch
BREADTH = 3       # max_breadth
MAX_DEPTH = 5
NHEAD = 8
HEAD_DIM = H // NHEAD
PRUNE = 0.3       # pruning_threshold
MAX_FRONTIER = 100
MAX_STEPS = 100
USE_VALUE_GUIDANCE = True
MAXP = 8          # static padded path length (>= MAX_DEPTH + 1), sublane aligned
N_STATS = 1 + BREADTH + BREADTH * BREADTH   # node + children + grandchildren = 13
assert MAXP >= MAX_DEPTH + 1

_VMEM = functools.partial(pl.BlockSpec, memory_space=pltpu.MemorySpace.VMEM)


# ------------------------------ kernel helpers -------------------------------
def _gelu(x):
    # TODO(synk): PyTorch nn.GELU/F.gelu default to exact erf GELU; tanh
    # approximation is used here (guaranteed Mosaic lowering via EUP tanh).
    c = 0.7978845608028654  # sqrt(2/pi)
    return 0.5 * x * (1.0 + jnp.tanh(c * (x + 0.044715 * x * x * x)))


def _sigmoid(x):
    # overflow-free stable sigmoid (no exp of large positive argument)
    z = jnp.exp(-jnp.abs(x))
    return jnp.where(x >= 0, 1.0 / (1.0 + z), z / (1.0 + z))


def _layernorm(x, g, b, eps=1e-5):
    m = jnp.mean(x, axis=-1, keepdims=True)
    v = jnp.mean((x - m) * (x - m), axis=-1, keepdims=True)
    return (x - m) * jax.lax.rsqrt(v + eps) * g + b


# ------------------------------ Pallas kernels -------------------------------
def _expand_kernel(x_ref, hs_ref, w1_ref, b1_ref, tgw2_ref, tgb2_ref,
                   vhw2_ref, vhb2_ref, cth_ref, gflat_ref, stats_ref):
    """Fused, speculative node expansion.

    Computes in ONE launch:
      * thoughts of the popped node (its children states)          -> cth_ref   [3, H]
      * thoughts of every child (speculative grandchildren states) -> gflat_ref [3, 3H]
      * (value, heuristic, cosine) for node + children + grandchildren
                                                                    -> stats_ref [13, 3]
        row 0 = node, rows 1..3 = children, row 4 + 3*c + i = thought i of child c.
    """
    x = x_ref[...]                                        # [1, H]  node state
    hs = hs_ref[...]                                      # [S, H]  example hidden
    w1 = w1_ref[...]                                      # [2H, 2H] packed first layers
    b1 = b1_ref[...]                                      # [2, 2H]
    tg_w1, vh_w1 = w1[0:H, :], w1[H:2 * H, :]
    tg_b1, vh_b1 = b1[0:1, :], b1[1:2, :]
    tg_w2 = tgw2_ref[...]                                 # [2H, H*BREADTH]
    tg_b2 = tgb2_ref[...]                                 # [1, H*BREADTH]

    # thought_generator for the node: Linear(H,2H) -> GELU -> Dropout(id) -> Linear
    h1 = _gelu(jnp.dot(x, tg_w1, preferred_element_type=jnp.float32) + tg_b1)
    flat1 = jnp.dot(h1, tg_w2, preferred_element_type=jnp.float32) + tg_b2     # [1, 3H]
    t1 = jnp.concatenate(
        [flat1[:, i * H:(i + 1) * H] for i in range(BREADTH)], axis=0)          # [3, H]

    # speculative thought_generator for every child (grandchildren states)
    h2 = _gelu(jnp.dot(t1, tg_w1, preferred_element_type=jnp.float32) + tg_b1)  # [3, 2H]
    flat2 = jnp.dot(h2, tg_w2, preferred_element_type=jnp.float32) + tg_b2      # [3, 3H]
    t2 = jnp.concatenate(
        [flat2[c:c + 1, i * H:(i + 1) * H]
         for c in range(BREADTH) for i in range(BREADTH)], axis=0)               # [9, H]

    all_states = jnp.concatenate([x, t1, t2], axis=0)                            # [13, H]

    # value_estimator + heuristic, batched over rows; second layer is block-diagonal
    h_vh = _gelu(jnp.dot(all_states, vh_w1, preferred_element_type=jnp.float32) + vh_b1)
    pre = jnp.dot(h_vh, vhw2_ref[...], preferred_element_type=jnp.float32) + vhb2_ref[...]
    value = _sigmoid(pre[:, 0:1])                         # [13, 1]
    heur = pre[:, 1:2]                                    # [13, 1]

    # cosine similarity against mean over sequence (PyTorch 1e-8 norm clamp)
    m = jnp.mean(hs, axis=0, keepdims=True)               # [1, H]
    dotp = jnp.sum(all_states * m, axis=1, keepdims=True)
    n1 = jnp.maximum(jnp.sqrt(jnp.sum(all_states * all_states, axis=1, keepdims=True)), 1e-8)
    n2 = jnp.maximum(jnp.sqrt(jnp.sum(m * m, axis=1, keepdims=True)), 1e-8)
    cos = dotp / (n1 * n2)                                # [13, 1]

    cth_ref[...] = t1
    gflat_ref[...] = flat2
    stats_ref[...] = jnp.concatenate([value, heur, cos], axis=1)


def _integrate_enhance_kernel(len_ref, path_ref, hid_ref,
                              wqkv_ref, bqkv_ref, wo_ref, ffw1_ref, ffb1_ref,
                              ffw2_ref, outw_ref, bvec_ref, o_ref):
    """Post-norm TransformerEncoderLayer over the (padded) path + masked mean,
    fused with the output-projection 'enhance' step.  One grid step per example."""
    b = pl.program_id(0)
    L = len_ref[b]                                        # valid path length (int32)
    x = path_ref[0]                                       # [MAXP, H], zero padded
    hid = hid_ref[0]                                      # [S, H]

    bvec = bvec_ref[...]                                  # [8, H] packed bias/LN vectors
    bo, ff_b2, out_b = bvec[0:1, :], bvec[1:2, :], bvec[2:3, :]
    ln1_g, ln1_b = bvec[3:4, :], bvec[4:5, :]
    ln2_g, ln2_b = bvec[5:6, :], bvec[6:7, :]

    # fused QKV projection
    qkv = jnp.dot(x, wqkv_ref[...], preferred_element_type=jnp.float32) + bqkv_ref[...]
    q, k, v = qkv[:, 0:H], qkv[:, H:2 * H], qkv[:, 2 * H:3 * H]
    kT = k.T

    # additive mask for padded key positions
    key_ids = jax.lax.broadcasted_iota(jnp.int32, (MAXP, MAXP), 1)
    neg = jnp.where(key_ids < L, 0.0, -1e30)

    scale = 1.0 / math.sqrt(HEAD_DIM)
    head_outs = []
    for h in range(NHEAD):
        lo = h * HEAD_DIM
        s = jnp.dot(q[:, lo:lo + HEAD_DIM], kT[lo:lo + HEAD_DIM, :],
                    preferred_element_type=jnp.float32) * scale + neg
        s = s - jnp.max(s, axis=-1, keepdims=True)
        p = jnp.exp(s)
        p = p / jnp.sum(p, axis=-1, keepdims=True)
        head_outs.append(jnp.dot(p, v[:, lo:lo + HEAD_DIM],
                                 preferred_element_type=jnp.float32))
    # one concatenated output projection instead of 8 sliced ones
    attn = jnp.dot(jnp.concatenate(head_outs, axis=1), wo_ref[...],
                   preferred_element_type=jnp.float32) + bo

    x1 = _layernorm(x + attn, ln1_g, ln1_b)
    hmid = _gelu(jnp.dot(x1, ffw1_ref[...], preferred_element_type=jnp.float32) + ffb1_ref[...])
    ff = jnp.dot(hmid, ffw2_ref[...], preferred_element_type=jnp.float32) + ff_b2
    x2 = _layernorm(x1 + ff, ln2_g, ln2_b)

    # masked mean over the real path length
    row_ids = jax.lax.broadcasted_iota(jnp.int32, (MAXP, H), 0)
    row_mask = jnp.where(row_ids < L, 1.0, 0.0)
    integrated = jnp.sum(x2 * row_mask, axis=0, keepdims=True) / L.astype(jnp.float32)

    # fused "enhance": hidden + Linear(hidden + 0.5 * tot_state)
    combined = hid + 0.5 * integrated
    proj = jnp.dot(combined, outw_ref[...], preferred_element_type=jnp.float32) + out_b
    o_ref[0] = hid + proj


# ------------------------- deterministic parameters --------------------------
def _w(k, shape, scale=0.05):
    return jax.random.normal(k, shape, dtype=jnp.float32) * scale


_pkeys = jax.random.split(jax.random.PRNGKey(1), 16)
P = {
    # thought_generator: Linear(H, 2H) -> GELU -> (Dropout) -> Linear(2H, H*BREADTH)
    "tg_w1": _w(_pkeys[0], (H, 2 * H)), "tg_b1": jnp.zeros((1, 2 * H), jnp.float32),
    "tg_w2": _w(_pkeys[1], (2 * H, H * BREADTH)), "tg_b2": jnp.zeros((1, H * BREADTH), jnp.float32),
    # value_estimator: Linear(H, H) -> GELU -> Linear(H, 1) -> Sigmoid
    "ve_w1": _w(_pkeys[2], (H, H)), "ve_b1": jnp.zeros((1, H), jnp.float32),
    "ve_w2": _w(_pkeys[3], (H, 1)), "ve_b2": jnp.zeros((1, 1), jnp.float32),
    # BestFirstSearch.heuristic: Linear(H, H) -> GELU -> Linear(H, 1)
    "h_w1": _w(_pkeys[4], (H, H)), "h_b1": jnp.zeros((1, H), jnp.float32),
    "h_w2": _w(_pkeys[5], (H, 1)), "h_b2": jnp.zeros((1, 1), jnp.float32),
    # state_integrator: TransformerEncoderLayer(d_model=H, nhead=8, ff=4H, gelu)
    "wq": _w(_pkeys[6], (H, H)), "bq": jnp.zeros((1, H), jnp.float32),
    "wk": _w(_pkeys[7], (H, H)), "bk": jnp.zeros((1, H), jnp.float32),
    "wv": _w(_pkeys[8], (H, H)), "bv": jnp.zeros((1, H), jnp.float32),
    "wo": _w(_pkeys[9], (H, H)), "bo": jnp.zeros((1, H), jnp.float32),
    "ff_w1": _w(_pkeys[10], (H, 4 * H)), "ff_b1": jnp.zeros((1, 4 * H), jnp.float32),
    "ff_w2": _w(_pkeys[11], (4 * H, H)), "ff_b2": jnp.zeros((1, H), jnp.float32),
    "ln1_g": jnp.ones((1, H), jnp.float32), "ln1_b": jnp.zeros((1, H), jnp.float32),
    "ln2_g": jnp.ones((1, H), jnp.float32), "ln2_b": jnp.zeros((1, H), jnp.float32),
    # output_projection: Linear(H, H)
    "out_w": _w(_pkeys[12], (H, H)), "out_b": jnp.zeros((1, H), jnp.float32),
}

# ---- packed parameter slabs (fewer VMEM inputs / DMAs per launch) -----------
_vh_w1 = jnp.concatenate([P["ve_w1"], P["h_w1"]], axis=1)          # [H, 2H]
_vh_b1 = jnp.concatenate([P["ve_b1"], P["h_b1"]], axis=1)          # [1, 2H]
_zH1 = jnp.zeros((H, 1), jnp.float32)
EP = {  # expansion-kernel params
    "w1": jnp.concatenate([P["tg_w1"], _vh_w1], axis=0),           # [2H, 2H]
    "b1": jnp.concatenate([P["tg_b1"], _vh_b1], axis=0),           # [2, 2H]
    "tg_w2": P["tg_w2"], "tg_b2": P["tg_b2"],
    "vh_w2": jnp.concatenate(                                       # block-diag [2H, 2]
        [jnp.concatenate([P["ve_w2"], _zH1], axis=1),
         jnp.concatenate([_zH1, P["h_w2"]], axis=1)], axis=0),
    "vh_b2": jnp.concatenate([P["ve_b2"], P["h_b2"]], axis=1),     # [1, 2]
}
IP = {  # integrate+enhance kernel params
    "wqkv": jnp.concatenate([P["wq"], P["wk"], P["wv"]], axis=1),  # [H, 3H]
    "bqkv": jnp.concatenate([P["bq"], P["bk"], P["bv"]], axis=1),  # [1, 3H]
    "wo": P["wo"], "ff_w1": P["ff_w1"], "ff_b1": P["ff_b1"], "ff_w2": P["ff_w2"],
    "out_w": P["out_w"],
    "bvec": jnp.concatenate([P["bo"], P["ff_b2"], P["out_b"],
                             P["ln1_g"], P["ln1_b"], P["ln2_g"], P["ln2_b"],
                             jnp.zeros((1, H), jnp.float32)], axis=0),   # [8, H]
}


# --------------------------- jitted kernel wrappers ---------------------------
@jax.jit
def expansion_call(x, hs):
    """x: [1, H] node state, hs: [S, H] example hidden.

    Returns:
      cth:   [BREADTH, H]             thoughts (children states) of the node
      gth:   [BREADTH, BREADTH, H]    gth[c, i] = thought i of child c (speculative)
      stats: [N_STATS, 3]             (value, heuristic, cosine); row 0 = node,
                                      rows 1..3 = children, row 4+3c+i = gth[c, i].
    """
    cth, gflat, stats = pl.pallas_call(
        _expand_kernel,
        out_shape=(jax.ShapeDtypeStruct((BREADTH, H), jnp.float32),
                   jax.ShapeDtypeStruct((BREADTH, BREADTH * H), jnp.float32),
                   jax.ShapeDtypeStruct((N_STATS, 3), jnp.float32)),
        in_specs=[_VMEM()] * 8,
        out_specs=(_VMEM(), _VMEM(), _VMEM()),
    )(x, hs, EP["w1"], EP["b1"], EP["tg_w2"], EP["tg_b2"], EP["vh_w2"], EP["vh_b2"])
    gth = gflat.reshape(BREADTH, BREADTH, H)      # cheap XLA reshape, same jit
    return cth, gth, stats


def _full_spec(arr):
    zeros = (0,) * arr.ndim
    return pl.BlockSpec(arr.shape, lambda b, lens: zeros)


@jax.jit
def integrate_enhance_call(lengths, paths, hid):
    """lengths: [B] int32, paths: [B, MAXP, H] (zero padded), hid: [B, S, H] -> [B, S, H]."""
    nb = hid.shape[0]
    grid_spec = pltpu.PrefetchScalarGridSpec(
        num_scalar_prefetch=1,                       # lengths -> SMEM
        grid=(nb,),
        in_specs=[
            pl.BlockSpec((1, MAXP, H), lambda b, lens: (b, 0, 0)),
            pl.BlockSpec((1, S, H), lambda b, lens: (b, 0, 0)),
            _full_spec(IP["wqkv"]), _full_spec(IP["bqkv"]), _full_spec(IP["wo"]),
            _full_spec(IP["ff_w1"]), _full_spec(IP["ff_b1"]), _full_spec(IP["ff_w2"]),
            _full_spec(IP["out_w"]), _full_spec(IP["bvec"]),
        ],
        out_specs=pl.BlockSpec((1, S, H), lambda b, lens: (b, 0, 0)),
    )
    return pl.pallas_call(
        _integrate_enhance_kernel,
        grid_spec=grid_spec,
        out_shape=jax.ShapeDtypeStruct((nb, S, H), jnp.float32),
        compiler_params=pltpu.CompilerParams(
            dimension_semantics=("parallel",)),      # v7x: one example per TensorCore
    )(lengths, paths, hid, IP["wqkv"], IP["bqkv"], IP["wo"], IP["ff_w1"],
      IP["ff_b1"], IP["ff_w2"], IP["out_w"], IP["bvec"])


# -------------------------- host-side tree search -----------------------------
class TreeNode:
    __slots__ = ("content", "state_np", "state_dev", "logprob", "parent",
                 "children", "value", "heur", "expansion")

    def __init__(self, content, state_np, state_dev, logprob=0.0, parent=None,
                 value=None, heur=None):
        self.content = content
        self.state_np = state_np          # np [H]  (hashing / path assembly)
        self.state_dev = state_dev        # jnp [1, H] (kernel input)
        self.logprob = logprob
        self.parent = parent
        self.children = []
        self.value = value                # cached value-estimator output
        self.heur = heur                  # cached heuristic output
        # expansion record: (thoughts_dev [3,H], thoughts_np [3,H],
        #                    stats_np [4,3], child_records or None)
        self.expansion = None


def _get_depth(node):
    d, cur = 0, node
    while cur.parent is not None:
        d += 1
        cur = cur.parent
    return d


def _ensure_expanded(node, ex_dev):
    """One fused pallas_call + one blocking host transfer covers this node AND
    pre-caches every child's expansion (one-level-ahead speculation)."""
    if node.expansion is None:
        cth_dev, gth_dev, stats_dev = expansion_call(node.state_dev, ex_dev)
        cth_np, gth_np, stats_np = jax.device_get((cth_dev, gth_dev, stats_dev))
        hdr = 1 + BREADTH
        child_recs = []
        for c in range(BREADTH):
            c_stats = np.concatenate(
                [stats_np[1 + c:2 + c],
                 stats_np[hdr + c * BREADTH: hdr + (c + 1) * BREADTH]], axis=0)  # [4, 3]
            child_recs.append((gth_dev[c], gth_np[c], c_stats, None))
        node.expansion = (cth_dev, cth_np, stats_np[:hdr], child_recs)
        if node.value is None:            # root: own value/heuristic from row 0
            node.value = float(stats_np[0, 0])
            node.heur = float(stats_np[0, 1])
    return node.expansion


def _evaluate(node):
    path_cost, cur, depth = 0.0, node, 0
    while cur.parent is not None:
        path_cost += cur.logprob
        cur = cur.parent
        depth += 1
    path_cost = path_cost / max(1, depth)
    return 0.7 * node.heur + 0.3 * path_cost


def _is_goal_state(node):
    if _get_depth(node) >= MAX_DEPTH:
        return True
    return node.value > 0.9


def _expand_thoughts(node, ex_dev):
    if _get_depth(node) >= MAX_DEPTH:
        return []
    thoughts_dev, thoughts_np, stats_np, child_recs = _ensure_expanded(node, ex_dev)
    children = []
    for i in range(BREADTH):
        logprob = float(stats_np[1 + i, 2])                 # cosine vs seq mean
        if logprob < PRUNE and len(children) > 0:
            continue
        child = TreeNode(f"Thought {len(node.children) + 1}",
                         thoughts_np[i], thoughts_dev[i:i + 1],
                         logprob=logprob, parent=node,
                         value=float(stats_np[1 + i, 0]),
                         heur=float(stats_np[1 + i, 1]))
        if child_recs is not None:
            child.expansion = child_recs[i]                 # speculative cache hit
        if USE_VALUE_GUIDANCE:
            if child.value >= PRUNE or len(children) == 0:
                node.children.append(child)
                children.append(child)
        else:
            node.children.append(child)
            children.append(child)
    if USE_VALUE_GUIDANCE:
        children.sort(key=lambda c: c.value, reverse=True)
    else:
        children.sort(key=lambda c: c.logprob, reverse=True)
    return children


def _best_first_search(root, expand_fn, goal_fn, max_steps=MAX_STEPS):
    frontier = [(_evaluate(root), 0, root)]
    best_node = root
    best_score = _evaluate(root)
    visited = set()
    step = 0
    while frontier and step < max_steps:
        _, _, current = frontier.pop(0)
        if goal_fn(current):
            return current
        score = _evaluate(current)
        if score > best_score:
            best_score, best_node = score, current
        for child in expand_fn(current):
            node_hash = hash(child.state_np.tobytes())
            if node_hash not in visited:
                visited.add(node_hash)
                frontier.append((_evaluate(child), step, child))
        frontier.sort(key=lambda e: (e[0], e[1]), reverse=True)
        if len(frontier) > MAX_FRONTIER:
            frontier = frontier[:MAX_FRONTIER]
        step += 1
    return best_node


def _collect_path(leaf):
    path, cur = [], leaf
    while cur is not None:
        path.append(cur)
        cur = cur.parent
    return path[::-1]


# ------------------------------ forward pass ----------------------------------
def tree_of_thoughts_forward(hidden_states):
    """hidden_states: [B, S, H]  ->  [B, S, H]"""
    nb = hidden_states.shape[0]
    hs_np = np.asarray(hidden_states)                   # one host copy (root states)
    lengths = np.zeros((nb,), dtype=np.int32)
    paths = np.zeros((nb, MAXP, H), dtype=np.float32)
    for i in range(nb):
        ex_dev = hidden_states[i]                       # [S, H] stays on device
        root = TreeNode("Root", hs_np[i, 0], ex_dev[0:1], 0.0)
        _ensure_expanded(root, ex_dev)                  # root value/heuristic + cache
        final = _best_first_search(
            root,
            expand_fn=lambda n: _expand_thoughts(n, ex_dev),
            goal_fn=_is_goal_state,
            max_steps=MAX_STEPS)
        path = _collect_path(final)
        # NOTE: the PyTorch torch.stack would error on mixed [1,H]/[H] node states
        # for depth>0 paths; we normalize every node state to [H] (intended semantics).
        for j, n in enumerate(path):
            paths[i, j] = n.state_np
        lengths[i] = len(path)
    # single batched integrate+enhance launch (static shapes -> compiled once)
    return integrate_enhance_call(jnp.asarray(lengths), jnp.asarray(paths), hidden_states)


# ----------------------------------- main --------------------------------------
if __name__ == "__main__":
    key = jax.random.PRNGKey(0)
    hidden_states = jax.random.normal(key, (B, S, H), dtype=jnp.float32)

    out = tree_of_thoughts_forward(hidden_states)
    out = jax.block_until_ready(out)

    assert out.shape == (B, S, H), out.shape
    assert bool(jnp.all(jnp.isfinite(out)))
    print("KERNEL_OK")
</pallas_src>

<mosaic_0001>
module attributes {stable_mosaic.version = 11 : i64} {
  func.func @_expand_kernel(%arg0: memref<1x32xf32, #tpu.memory_space<vmem>>, %arg1: memref<8x32xf32, #tpu.memory_space<vmem>>, %arg2: memref<64x64xf32, #tpu.memory_space<vmem>>, %arg3: memref<2x64xf32, #tpu.memory_space<vmem>>, %arg4: memref<64x96xf32, #tpu.memory_space<vmem>>, %arg5: memref<1x96xf32, #tpu.memory_space<vmem>>, %arg6: memref<64x2xf32, #tpu.memory_space<vmem>>, %arg7: memref<1x2xf32, #tpu.memory_space<vmem>>, %arg8: memref<3x32xf32, #tpu.memory_space<vmem>>, %arg9: memref<3x96xf32, #tpu.memory_space<vmem>>, %arg10: memref<13x3xf32, #tpu.memory_space<vmem>>) attributes {dimension_semantics = [], scalar_prefetch = 0 : i64, scratch_operands = 0 : i64, tpu.core_type = #tpu.core_type<tc>} {
    %c0 = arith.constant 0 : index
    %c0_0 = arith.constant 0 : index
    %0 = vector.load %arg0[%c0, %c0_0] : memref<1x32xf32, #tpu.memory_space<vmem>>, vector<1x32xf32>
    %c0_1 = arith.constant 0 : index
    %c0_2 = arith.constant 0 : index
    %1 = vector.load %arg1[%c0_1, %c0_2] : memref<8x32xf32, #tpu.memory_space<vmem>>, vector<8x32xf32>
    %c0_3 = arith.constant 0 : index
    %c0_4 = arith.constant 0 : index
    %2 = vector.load %arg2[%c0_3, %c0_4] : memref<64x64xf32, #tpu.memory_space<vmem>>, vector<64x64xf32>
    %c0_5 = arith.constant 0 : index
    %c0_6 = arith.constant 0 : index
    %3 = vector.load %arg3[%c0_5, %c0_6] : memref<2x64xf32, #tpu.memory_space<vmem>>, vector<2x64xf32>
    %4 = vector.extract_strided_slice %2 {offsets = [0, 0], sizes = [32, 64], strides = [1, 1]} : vector<64x64xf32> to vector<32x64xf32>
    %5 = vector.extract_strided_slice %2 {offsets = [32, 0], sizes = [32, 64], strides = [1, 1]} : vector<64x64xf32> to vector<32x64xf32>
    %6 = vector.extract_strided_slice %3 {offsets = [0, 0], sizes = [1, 64], strides = [1, 1]} : vector<2x64xf32> to vector<1x64xf32>
    %7 = vector.extract_strided_slice %3 {offsets = [1, 0], sizes = [1, 64], strides = [1, 1]} : vector<2x64xf32> to vector<1x64xf32>
    %c0_7 = arith.constant 0 : index
    %c0_8 = arith.constant 0 : index
    %8 = vector.load %arg4[%c0_7, %c0_8] : memref<64x96xf32, #tpu.memory_space<vmem>>, vector<64x96xf32>
    %c0_9 = arith.constant 0 : index
    %c0_10 = arith.constant 0 : index
    %9 = vector.load %arg5[%c0_9, %c0_10] : memref<1x96xf32, #tpu.memory_space<vmem>>, vector<1x96xf32>
    %cst = arith.constant dense<0.000000e+00> : vector<1x64xf32>
    %10 = tpu.matmul %0, %4, %cst {dimension_numbers = #tpu.dot_dimension_numbers<[1], [0], [0], [1], [0, 0, 1, 1], [], []>} : vector<1x32xf32>, vector<32x64xf32>, vector<1x64xf32> -> vector<1x64xf32>
    %11 = arith.addf %10, %6 : vector<1x64xf32>
    %cst_11 = arith.constant 5.000000e-01 : f32
    %12 = vector.broadcast %cst_11 : f32 to vector<1x64xf32>
    %13 = arith.mulf %12, %11 : vector<1x64xf32>
    %cst_12 = arith.constant 4.471500e-02 : f32
    %14 = vector.broadcast %cst_12 : f32 to vector<1x64xf32>
    %15 = arith.mulf %14, %11 : vector<1x64xf32>
    %16 = arith.mulf %15, %11 : vector<1x64xf32>
    %17 = arith.mulf %16, %11 : vector<1x64xf32>
    %18 = arith.addf %11, %17 : vector<1x64xf32>
    %cst_13 = arith.constant 0.797884583 : f32
    %19 = vector.broadcast %cst_13 : f32 to vector<1x64xf32>
    %20 = arith.mulf %19, %18 : vector<1x64xf32>
    %21 = math.tanh %20 : vector<1x64xf32>
    %cst_14 = arith.constant 1.000000e+00 : f32
    %22 = vector.broadcast %cst_14 : f32 to vector<1x64xf32>
    %23 = arith.addf %22, %21 : vector<1x64xf32>
    %24 = arith.mulf %13, %23 : vector<1x64xf32>
    %cst_15 = arith.constant dense<0.000000e+00> : vector<1x96xf32>
    %25 = tpu.matmul %24, %8, %cst_15 {dimension_numbers = #tpu.dot_dimension_numbers<[1], [0], [0], [1], [0, 0, 1, 1], [], []>} : vector<1x64xf32>, vector<64x96xf32>, vector<1x96xf32> -> vector<1x96xf32>
    %26 = arith.addf %25, %9 : vector<1x96xf32>
    %27 = vector.extract_strided_slice %26 {offsets = [0, 0], sizes = [1, 32], strides = [1, 1]} : vector<1x96xf32> to vector<1x32xf32>
    %28 = vector.extract_strided_slice %26 {offsets = [0, 32], sizes = [1, 32], strides = [1, 1]} : vector<1x96xf32> to vector<1x32xf32>
    %29 = vector.extract_strided_slice %26 {offsets = [0, 64], sizes = [1, 32], strides = [1, 1]} : vector<1x96xf32> to vector<1x32xf32>
    %30 = tpu.concatenate %27, %28, %29 in 0 : vector<1x32xf32>, vector<1x32xf32>, vector<1x32xf32> -> vector<3x32xf32>
    %cst_16 = arith.constant dense<0.000000e+00> : vector<3x64xf32>
    %31 = tpu.matmul %30, %4, %cst_16 {dimension_numbers = #tpu.dot_dimension_numbers<[1], [0], [0], [1], [0, 0, 1, 1], [], []>} : vector<3x32xf32>, vector<32x64xf32>, vector<3x64xf32> -> vector<3x64xf32>
    %32 = vector.broadcast %6 : vector<1x64xf32> to vector<3x64xf32>
    %33 = arith.addf %31, %32 : vector<3x64xf32>
    %cst_17 = arith.constant 5.000000e-01 : f32
    %34 = vector.broadcast %cst_17 : f32 to vector<3x64xf32>
    %35 = arith.mulf %34, %33 : vector<3x64xf32>
    %cst_18 = arith.constant 4.471500e-02 : f32
    %36 = vector.broadcast %cst_18 : f32 to vector<3x64xf32>
    %37 = arith.mulf %36, %33 : vector<3x64xf32>
    %38 = arith.mulf %37, %33 : vector<3x64xf32>
    %39 = arith.mulf %38, %33 : vector<3x64xf32>
    %40 = arith.addf %33, %39 : vector<3x64xf32>
    %cst_19 = arith.constant 0.797884583 : f32
    %41 = vector.broadcast %cst_19 : f32 to vector<3x64xf32>
    %42 = arith.mulf %41, %40 : vector<3x64xf32>
    %43 = math.tanh %42 : vector<3x64xf32>
    %cst_20 = arith.constant 1.000000e+00 : f32
    %44 = vector.broadcast %cst_20 : f32 to vector<3x64xf32>
    %45 = arith.addf %44, %43 : vector<3x64xf32>
    %46 = arith.mulf %35, %45 : vector<3x64xf32>
    %cst_21 = arith.constant dense<0.000000e+00> : vector<3x96xf32>
    %47 = tpu.matmul %46, %8, %cst_21 {dimension_numbers = #tpu.dot_dimension_numbers<[1], [0], [0], [1], [0, 0, 1, 1], [], []>} : vector<3x64xf32>, vector<64x96xf32>, vector<3x96xf32> -> vector<3x96xf32>
    %48 = vector.broadcast %9 : vector<1x96xf32> to vector<3x96xf32>
    %49 = arith.addf %47, %48 : vector<3x96xf32>
    %50 = vector.extract_strided_slice %49 {offsets = [0, 0], sizes = [1, 32], strides = [1, 1]} : vector<3x96xf32> to vector<1x32xf32>
    %51 = vector.extract_strided_slice %49 {offsets = [0, 32], sizes = [1, 32], strides = [1, 1]} : vector<3x96xf32> to vector<1x32xf32>
    %52 = vector.extract_strided_slice %49 {offsets = [0, 64], sizes = [1, 32], strides = [1, 1]} : vector<3x96xf32> to vector<1x32xf32>
    %53 = vector.extract_strided_slice %49 {offsets = [1, 0], sizes = [1, 32], strides = [1, 1]} : vector<3x96xf32> to vector<1x32xf32>
    %54 = vector.extract_strided_slice %49 {offsets = [1, 32], sizes = [1, 32], strides = [1, 1]} : vector<3x96xf32> to vector<1x32xf32>
    %55 = vector.extract_strided_slice %49 {offsets = [1, 64], sizes = [1, 32], strides = [1, 1]} : vector<3x96xf32> to vector<1x32xf32>
    %56 = vector.extract_strided_slice %49 {offsets = [2, 0], sizes = [1, 32], strides = [1, 1]} : vector<3x96xf32> to vector<1x32xf32>
    %57 = vector.extract_strided_slice %49 {offsets = [2, 32], sizes = [1, 32], strides = [1, 1]} : vector<3x96xf32> to vector<1x32xf32>
    %58 = vector.extract_strided_slice %49 {offsets = [2, 64], sizes = [1, 32], strides = [1, 1]} : vector<3x96xf32> to vector<1x32xf32>
    %59 = tpu.concatenate %50, %51, %52, %53, %54, %55, %56, %57, %58 in 0 : vector<1x32xf32>, vector<1x32xf32>, vector<1x32xf32>, vector<1x32xf32>, vector<1x32xf32>, vector<1x32xf32>, vector<1x32xf32>, vector<1x32xf32>, vector<1x32xf32> -> vector<9x32xf32>
    %60 = tpu.concatenate %0, %30, %59 in 0 : vector<1x32xf32>, vector<3x32xf32>, vector<9x32xf32> -> vector<13x32xf32>
    %cst_22 = arith.constant dense<0.000000e+00> : vector<13x64xf32>
    %61 = tpu.matmul %60, %5, %cst_22 {dimension_numbers = #tpu.dot_dimension_numbers<[1], [0], [0], [1], [0, 0, 1, 1], [], []>} : vector<13x32xf32>, vector<32x64xf32>, vector<13x64xf32> -> vector<13x64xf32>
    %62 = vector.broadcast %7 : vector<1x64xf32> to vector<13x64xf32>
    %63 = arith.addf %61, %62 : vector<13x64xf32>
    %cst_23 = arith.constant 5.000000e-01 : f32
    %64 = vector.broadcast %cst_23 : f32 to vector<13x64xf32>
    %65 = arith.mulf %64, %63 : vector<13x64xf32>
    %cst_24 = arith.constant 4.471500e-02 : f32
    %66 = vector.broadcast %cst_24 : f32 to vector<13x64xf32>
    %67 = arith.mulf %66, %63 : vector<13x64xf32>
    %68 = arith.mulf %67, %63 : vector<13x64xf32>
    %69 = arith.mulf %68, %63 : vector<13x64xf32>
    %70 = arith.addf %63, %69 : vector<13x64xf32>
    %cst_25 = arith.constant 0.797884583 : f32
    %71 = vector.broadcast %cst_25 : f32 to vector<13x64xf32>
    %72 = arith.mulf %71, %70 : vector<13x64xf32>
    %73 = math.tanh %72 : vector<13x64xf32>
    %cst_26 = arith.constant 1.000000e+00 : f32
    %74 = vector.broadcast %cst_26 : f32 to vector<13x64xf32>
    %75 = arith.addf %74, %73 : vector<13x64xf32>
    %76 = arith.mulf %65, %75 : vector<13x64xf32>
    %c0_27 = arith.constant 0 : index
    %c0_28 = arith.constant 0 : index
    %77 = vector.load %arg6[%c0_27, %c0_28] : memref<64x2xf32, #tpu.memory_space<vmem>>, vector<64x2xf32>
    %cst_29 = arith.constant dense<0.000000e+00> : vector<13x2xf32>
    %78 = tpu.matmul %76, %77, %cst_29 {dimension_numbers = #tpu.dot_dimension_numbers<[1], [0], [0], [1], [0, 0, 1, 1], [], []>} : vector<13x64xf32>, vector<64x2xf32>, vector<13x2xf32> -> vector<13x2xf32>
    %c0_30 = arith.constant 0 : index
    %c0_31 = arith.constant 0 : index
    %79 = vector.load %arg7[%c0_30, %c0_31] : memref<1x2xf32, #tpu.memory_space<vmem>>, vector<1x2xf32>
    %80 = vector.broadcast %79 : vector<1x2xf32> to vector<13x2xf32>
    %81 = arith.addf %78, %80 : vector<13x2xf32>
    %82 = vector.extract_strided_slice %81 {offsets = [0, 0], sizes = [13, 1], strides = [1, 1]} : vector<13x2xf32> to vector<13x1xf32>
    %83 = math.absf %82 : vector<13x1xf32>
    %cst_32 = arith.constant 0.000000e+00 : f32
    %84 = vector.broadcast %cst_32 : f32 to vector<13x1xf32>
    %85 = arith.subf %84, %83 : vector<13x1xf32>
    %86 = math.exp %85 : vector<13x1xf32>
    %cst_33 = arith.constant 0.000000e+00 : f32
    %87 = vector.broadcast %cst_33 : f32 to vector<13x1xf32>
    %88 = arith.cmpf oge, %82, %87 : vector<13x1xf32>
    %cst_34 = arith.constant 1.000000e+00 : f32
    %89 = vector.broadcast %cst_34 : f32 to vector<13x1xf32>
    %90 = arith.addf %89, %86 : vector<13x1xf32>
    %cst_35 = arith.constant 1.000000e+00 : f32
    %91 = vector.broadcast %cst_35 : f32 to vector<13x1xf32>
    %92 = arith.divf %91, %90 : vector<13x1xf32>
    %cst_36 = arith.constant 1.000000e+00 : f32
    %93 = vector.broadcast %cst_36 : f32 to vector<13x1xf32>
    %94 = arith.addf %93, %86 : vector<13x1xf32>
    %95 = arith.divf %86, %94 : vector<13x1xf32>
    %96 = arith.select %88, %92, %95 : vector<13x1xi1>, vector<13x1xf32>
    %97 = vector.extract_strided_slice %81 {offsets = [0, 1], sizes = [13, 1], strides = [1, 1]} : vector<13x2xf32> to vector<13x1xf32>
    %cst_37 = arith.constant dense<0.000000e+00> : vector<32xf32>
    %98 = vector.multi_reduction <add>, %1, %cst_37 [0] : vector<8x32xf32> to vector<32xf32>
    %99 = vector.shape_cast %98 : vector<32xf32> to vector<1x32xf32>
    %cst_38 = arith.constant 8.000000e+00 : f32
    %100 = vector.broadcast %cst_38 : f32 to vector<1x32xf32>
    %101 = arith.divf %99, %100 : vector<1x32xf32>
    %102 = vector.broadcast %101 : vector<1x32xf32> to vector<13x32xf32>
    %103 = arith.mulf %60, %102 : vector<13x32xf32>
    %cst_39 = arith.constant dense<0.000000e+00> : vector<13xf32>
    %104 = vector.multi_reduction <add>, %103, %cst_39 [1] : vector<13x32xf32> to vector<13xf32>
    %105 = vector.shape_cast %104 : vector<13xf32> to vector<13x1xf32>
    %106 = arith.mulf %60, %60 : vector<13x32xf32>
    %cst_40 = arith.constant dense<0.000000e+00> : vector<13xf32>
    %107 = vector.multi_reduction <add>, %106, %cst_40 [1] : vector<13x32xf32> to vector<13xf32>
    %108 = vector.shape_cast %107 : vector<13xf32> to vector<13x1xf32>
    %109 = math.sqrt %108 : vector<13x1xf32>
    %cst_41 = arith.constant 9.99999993E-9 : f32
    %110 = vector.broadcast %cst_41 : f32 to vector<13x1xf32>
    %111 = arith.maximumf %109, %110 : vector<13x1xf32>
    %112 = arith.mulf %101, %101 : vector<1x32xf32>
    %cst_42 = arith.constant dense<0.000000e+00> : vector<1xf32>
    %113 = vector.multi_reduction <add>, %112, %cst_42 [1] : vector<1x32xf32> to vector<1xf32>
    %114 = vector.shape_cast %113 : vector<1xf32> to vector<1x1xf32>
    %115 = math.sqrt %114 : vector<1x1xf32>
    %cst_43 = arith.constant 9.99999993E-9 : f32
    %116 = vector.broadcast %cst_43 : f32 to vector<1x1xf32>
    %117 = arith.maximumf %115, %116 : vector<1x1xf32>
    %118 = vector.broadcast %117 : vector<1x1xf32> to vector<13x1xf32>
    %119 = arith.mulf %111, %118 : vector<13x1xf32>
    %120 = arith.divf %105, %119 : vector<13x1xf32>
    %c0_44 = arith.constant 0 : index
    %c0_45 = arith.constant 0 : index
    %121 = vector.load %arg8[%c0_44, %c0_45] : memref<3x32xf32, #tpu.memory_space<vmem>>, vector<3x32xf32>
    tpu.vector_store %arg8[%c0_44, %c0_45], %30 {strides = array<i32>} : memref<3x32xf32, #tpu.memory_space<vmem>>, vector<3x32xf32>,
    %c0_46 = arith.constant 0 : index
    %c0_47 = arith.constant 0 : index
    %122 = vector.load %arg9[%c0_46, %c0_47] : memref<3x96xf32, #tpu.memory_space<vmem>>, vector<3x96xf32>
    tpu.vector_store %arg9[%c0_46, %c0_47], %49 {strides = array<i32>} : memref<3x96xf32, #tpu.memory_space<vmem>>, vector<3x96xf32>,
    %123 = tpu.concatenate %96, %97, %120 in 1 : vector<13x1xf32>, vector<13x1xf32>, vector<13x1xf32> -> vector<13x3xf32>
    %c0_48 = arith.constant 0 : index
    %c0_49 = arith.constant 0 : index
    %124 = vector.load %arg10[%c0_48, %c0_49] : memref<13x3xf32, #tpu.memory_space<vmem>>, vector<13x3xf32>
    tpu.vector_store %arg10[%c0_48, %c0_49], %123 {strides = array<i32>} : memref<13x3xf32, #tpu.memory_space<vmem>>, vector<13x3xf32>,
    return
  }
}

</mosaic_0001>

<bundles_post_ra>
// kernel: expansion_call.1
= control target key start
LH: loop header
LB: loop body
LE: loop exit
PB: predicated region body
PF: predicated region fallthrough
CT: control target
= control target key end

     0   :  { %16 = vsyncpa [#allocation3], 0  ;;  %s1347_s0 = inlined_call_operand.vmem [shape: f32[1,32], index: 0, kind: input, shape index: {}]   ;;  %s1348_s1 = inlined_call_operand.vmem [shape: f32[8,32], index: 1, kind: input, shape index: {}]   ;;  %s1349_s2 = inlined_call_operand.hbm [shape: f32[64,64], index: 2, kind: input, shape index: {}]   ;;  %s1350_s3 = inlined_call_operand.vmem [shape: f32[2,64], index: 3, kind: input, shape index: {}]   ;;  %s1351_s4 = inlined_call_operand.hbm [shape: f32[64,96], index: 4, kind: input, shape index: {}]   ;;  %s1352_s5 = inlined_call_operand.vmem [shape: f32[1,96], index: 5, kind: input, shape index: {}]   ;;  %s1353_s6 = inlined_call_operand.hbm [shape: f32[64,2], index: 6, kind: input, shape index: {}]   ;;  %s1354_s7 = inlined_call_operand.vmem [shape: f32[1,2], index: 7, kind: input, shape index: {}]   ;;  %s1355_s8 = inlined_call_operand.hbm [shape: f32[3,32], index: 8, kind: output, shape index: {0}]   ;;  %s1356_s9 = inlined_call_operand.vmem [shape: f32[3,96], index: 9, kind: output, shape index: {1}]   ;;  %s1357_s10 = inlined_call_operand.vmem [shape: f32[13,3], index: 10, kind: output, shape index: {2}]  }
   0x1   :  { %17 = vsyncpa [#allocation6], 0 }
   0x2   :  { %18 = vsyncpa [#allocation4], 0  ;;  %s1127_s13 = smov [#allocation5]   ;;  %s1128_s15 = smov [#allocation2]  }
   0x3   :  { %s42_s14 = sshll.u32 %s1127_s13, 4  ;;  %s28_s16 = sshll.u32 %s1128_s15, 4  ;;  %s43_s14 = int_to_ptr.vmem [resolvable:$true] %s42_s14  ;;  %s1193_s16 = int_to_ptr.vmem [resolvable:$true] %s28_s16 }
   0x4   :  { %s1033_s19 = scalar_lea.hbm %s1351_s4, 1024 }
   0x5   :  { %p1034_p0 = scmp.ne.s32.totalorder %s1351_s4, %s1033_s19  ;;  %p1037_p1 = scmp.lt.u32.totalorder %s1033_s19, %s1351_s4 }
   0x7   :  { %p1039_p2 = pnand %p1037_p1, %p1034_p0 }
   0x9   :  { %1042 = shalt.err (!%p1039_p2)
}
   0xa   :  { %s1043_s24 = scalar_lea.vmem %s43_s14, 1024  ;;  %p1048_p4 = scmp.lt.s32.totalorder %s43_s14, %s43_s14 }
   0xb   :  { %p1044_p3 = scmp.ne.s32.totalorder %s43_s14, %s1043_s24  ;;  %p1049_p5 = scmp.lt.s32.totalorder %s1043_s24, %s1043_s24 }
   0xd   :  { %p1050_p6 = por %p1049_p5, %p1048_p4 }
   0xf   :  { %p1051_p7 = pnand %p1050_p6, %p1044_p3 }
  0x11   :  { %1054 = shalt.err (!%p1051_p7)
}
  0x12   :  { %s1129_s25 = smov 128   ;;  %s1130_s26 = smov 8  }
  0x13   :  { %48 = dma.hbm_to_vmem [thread:$0]  %s1351_s4, 1024, %s43_s14, [#allocation6], %s1129_s25, %s1129_s25, %s1130_s26  }
  0x14   :  { %s1055_s11 = scalar_lea.hbm %s1349_s2, 1024 }
  0x15   :  { %p1056_p8 = scmp.ne.s32.totalorder %s1349_s2, %s1055_s11  ;;  %p1059_p9 = scmp.lt.u32.totalorder %s1055_s11, %s1349_s2 }
  0x17   :  { %p1061_p10 = pnand %p1059_p9, %p1056_p8 }
  0x19   :  { %1064 = shalt.err (!%p1061_p10)
}
  0x1a   :  { %s1065_s18 = scalar_lea.vmem %s1193_s16, 1024  ;;  %p1070_p12 = scmp.lt.s32.totalorder %s1193_s16, %s1193_s16 }
  0x1b   :  { %p1066_p11 = scmp.ne.s32.totalorder %s1193_s16, %s1065_s18  ;;  %p1071_p13 = scmp.lt.s32.totalorder %s1065_s18, %s1065_s18 }
  0x1d   :  { %p1072_p0 = por %p1071_p13, %p1070_p12 }
  0x1f   :  { %p1073_p1 = pnand %p1072_p0, %p1066_p11 }
  0x21   :  { %1076 = shalt.err (!%p1073_p1)
}
  0x22   :  { %34 = dma.hbm_to_vmem [thread:$0]  %s1349_s2, 1024, %s1193_s16, [#allocation3], %s1129_s25, %s1129_s25, %s1130_s26  }
  0x23   :  { %s1131_s19 = smov [#allocation7]   ;;  %s1077_s23 = scalar_lea.hbm %s1353_s6, 1024 }
  0x24   :  { %s56_s20 = sshll.u32 %s1131_s19, 4  ;;  %p1078_p2 = scmp.ne.s32.totalorder %s1353_s6, %s1077_s23  ;;  %s57_s20 = int_to_ptr.vmem [resolvable:$true] %s56_s20 }
  0x25   :  { %p1081_p3 = scmp.lt.u32.totalorder %s1077_s23, %s1353_s6 }
  0x27   :  { %p1083_p4 = pnand %p1081_p3, %p1078_p2 }
  0x29   :  { %1086 = shalt.err (!%p1083_p4)
}
  0x2a   :  { %s1087_s30 = scalar_lea.vmem %s57_s20, 1024  ;;  %p1092_p6 = scmp.lt.s32.totalorder %s57_s20, %s57_s20 }
  0x2b   :  { %p1088_p5 = scmp.ne.s32.totalorder %s57_s20, %s1087_s30  ;;  %p1093_p7 = scmp.lt.s32.totalorder %s1087_s30, %s1087_s30 }
  0x2d   :  { %p1094_p8 = por %p1093_p7, %p1092_p6 }
  0x2f   :  { %p1095_p9 = pnand %p1094_p8, %p1088_p5 }
  0x31   :  { %1098 = shalt.err (!%p1095_p9)
}
  0x32   :  { %62 = dma.hbm_to_vmem [thread:$0]  %s1353_s6, 1024, %s57_s20, [#allocation6], %s1129_s25, %s1129_s25, %s1130_s26  }
  0x33   :  { %1121 = dma.done.wait [#allocation3], 1024  }
  0x34   :  { %1122 = vsyncadd [#allocation3], 4294966272 }
  0x35   :  { %1123 = dma.done.wait [#allocation6], 2048  }
  0x36   :  { %1124 = vsyncadd [#allocation6], 4294965248  ;;  %v1132_v0 = vmov 0.0|0.0   ;;  %vm1133_vm0 = vmmov 0   ;;  %v1134_v1 = vmov 0.0   ;;  %v76_v2 = vld [vmem:[#allocation2] sm:$0xff]  ;;  %v264_v44 = vlaneseq }
  0x37   :  { %936 = vmatprep.subr.bf16.mxu0 %v1132_v0  ;;  %854 = vmatprep.mubr.msk.f32.mxu0 %vm1133_vm0, %v1134_v1  ;;  %v77_v3 = vld [vmem:[#allocation2 + $0x8] sm:$0xff]  ;;  %v78_v4 = vld [vmem:[#allocation2 + $0x10] sm:$0xff]  ;;  %v79_v6 = vld [vmem:[#allocation2 + $0x18] sm:$0xff]  ;;  %vm94_vm1 = vcmask 261120   ;;  %vm177_vm2 = vcmask 523264   ;;  %s1135_s12 = smov 96  }
  0x38   :  { %942 = vmatprep.subr.bf16.mxu1 %v1132_v0  ;;  %873 = vmatprep.mubr.msk.f32.mxu1 %vm1133_vm0, %v1134_v1  ;;  %v937_v5 = vpack.c.bf16 %v77_v3, %v76_v2  ;;  %v940_v7 = vpack.c.bf16 %v79_v6, %v78_v4  ;;  %v1255_v8 = vld [vmem:[%s1347_s0] sm:$0x1]  ;;  %v86_v10 = vld [vmem:[#allocation5 + $0x8] sm:$0xff]  ;;  %v87_v11 = vld [vmem:[#allocation5 + $0x10] sm:$0xff]  ;;  %s1136_s13 = smov 64   ;;  %vm260_vm3 = vcmask 1040384  }
  0x39   :  { %v85_v9 = vld [vmem:[#allocation5] sm:$0xff]  ;;  %v88_v13 = vld [vmem:[#allocation5 + $0x18] sm:$0xff]  ;;  %v90_v16 = vld [vmem:[#allocation5 + $0x28] sm:$0xff]  ;;  %vm262_vm4 = vcmask 1041408   ;;  %vm755_vm5 = vcmask 256000   ;;  %v1291_v45 = vshrl.u32 %v264_v44, 7 }
  0x3a   :  { %938 = vmatpush3.bf16.msra.mxu0 %v937_v5  ;;  %v943_v12 = vpack.c.bf16 %v86_v10, %v85_v9  ;;  %v946_v14 = vpack.c.bf16 %v88_v13, %v87_v11  ;;  %v89_v15 = vld [vmem:[#allocation5 + $0x20] sm:$0xff]  ;;  %v91_v18 = vld [vmem:[#allocation5 + $0x30] sm:$0xff]  ;;  %v92_v19 = vld [vmem:[#allocation5 + $0x38] sm:$0xff]  ;;  %vm757_vm6 = vcmask 780288   ;;  %vm457_vm7 = vcmask 1042432  }
  0x3b   :  { %939 = vmatprep.subr.bf16.mxu0 %v1132_v0  ;;  %v949_v17 = vpack.c.bf16 %v90_v16, %v89_v15  ;;  %v952_v20 = vpack.c.bf16 %v92_v19, %v91_v18  ;;  %v1270_v21 = vld [vmem:[%s1350_s3] sm:$0x3]  ;;  %v266_v46 = vsub.s32 0, %v1291_v45  ;;  %v81_v62 = vld [vmem:[#allocation2 + $0x28] sm:$0xff]  ;;  %v82_v3 = vld [vmem:[#allocation2 + $0x30] sm:$0xff]  ;;  %vm459_vm8 = vcmask 1043456  }
  0x3c   :  { %944 = vmatpush3.bf16.msra.mxu1 %v943_v12  ;;  %v93_v34 = vld [vmem:[%s1352_s5] sm:$0x1]  ;;  %v83_v4 = vld [vmem:[#allocation2 + $0x38] sm:$0xff]  ;;  %vm461_vm9 = vcmask 1044480   ;;  %vm463_vm10 = vcmask 1045504   ;;  %vm465_vm11 = vcmask 1046528  }
  0x3d   :  { %945 = vmatprep.subr.bf16.mxu1 %v1132_v0  ;;  %v267_v47 = vrot.slane %v1270_v21, %v266_v46  ;;  %v354_v60 = vrot.slane %v93_v34, %v266_v46  ;;  %v80_v61 = vld [vmem:[#allocation2 + $0x20] sm:$0xff]  ;;  %vm709_vm12 = vcmask 258048  }
  0x3e   :  { %941 = vmatpush3.bf16.msra.mxu0 %v940_v7  ;;  %v972_v63 = vpack.c.bf16 %v81_v62, %v80_v61  ;;  %v75_v13 = vld [vmem:[%s1348_s1] sm:$0xff]  ;;  %v585_v61 = vld [vmem:[#allocation7 + $0x30] sm:$0xff]  ;;  %v586_v62 = vld [vmem:[#allocation7 + $0x38] sm:$0xff]  ;;  %s1137_s1 = smov [#allocation8]  }
  0x3f   :  { %954 = vmatprep.subr.bf16.mxu0 %v1132_v0  ;;  %s775_s18 = sshll.u32 %s1137_s1, 4  ;;  %s776_s18 = int_to_ptr.vmem [resolvable:$true] %s775_s18 }
  0x40   :  { %947 = vmatpush3.bf16.msra.mxu1 %v946_v14  ;;  %s1099_s4 = scalar_lea.vmem %s776_s18, 64  ;;  %p1104_p11 = scmp.lt.s32.totalorder %s776_s18, %s776_s18 }
  0x41   :  { %855 = vmatmul.mubr.msk.f32.vlgmr.msra.gmra.mrb[0].mxu0 %vm94_vm1, %v1255_v8  ;;  %948 = vmatprep.subr.bf16.mxu1 %v1132_v0  ;;  %p1100_p10 = scmp.ne.s32.totalorder %s776_s18, %s1099_s4  ;;  %p1105_p12 = scmp.lt.s32.totalorder %s1099_s4, %s1099_s4 }
  0x42   :  { %956 = vmatpush3.bf16.msra.mxu0 %v937_v5  ;;  %884 = vmatprep.mubr.msk.f32.mxu0 %vm1133_vm0, %v1134_v1  ;;  %v976_v5 = vpack.c.bf16 %v83_v4, %v82_v3 }
  0x43   :  { %957 = vmatprep.subr.bf16.mxu0 %v1132_v0  ;;  %p1106_p13 = por %p1105_p12, %p1104_p11 }
  0x44   :  { %950 = vmatpush3.bf16.msra.mxu1 %v949_v17 }
  0x45   :  { %951 = vmatprep.subr.bf16.mxu1 %v1132_v0  ;;  %p1107_p0 = pnand %p1106_p13, %p1100_p10 }
  0x46   :  { %959 = vmatpush3.bf16.msra.mxu0 %v940_v7 }
  0x47   :  { %960 = vmatprep.subr.bf16.mxu0 %v1132_v0 }
  0x48   :  { %953 = vmatpush3.bf16.msra.mxu1 %v952_v20 }
  0x49   :  { %973 = vmatprep.subr.bf16.mxu1 %v972_v63 }
 0x114   :  { %v164_v22 = vpop.f32.mrb[0].mxu0 }
 0x115   :  { %v165_v23 = vadd.f32 %v164_v22, %v1270_v21  ;;  %v856_v24 = vpop.f32.mrb[1].mxu0 }
 0x117   :  { %v169_v25 = vmul.f32 0.044715, %v165_v23  ;;  %v168_v31 = vmul.f32 0.5, %v165_v23 }
 0x119   :  { %v170_v26 = vmul.f32 %v169_v25, %v165_v23 }
 0x11b   :  { %v171_v27 = vmul.f32 %v170_v26, %v165_v23 }
 0x11d   :  { %v172_v28 = vadd.f32 %v171_v27, %v165_v23 }
 0x11f   :  { %v173_v29 = vmul.f32 0.7978846, %v172_v28 }
 0x121   :  { %1007 = vtanh.f32 %v173_v29 }
 0x12b   :  { %v1008_v30 = vpop.eup %1007 }
 0x12c   :  { %v175_v32 = vadd.f32 1.0, %v1008_v30 }
 0x12e   :  { %v176_v33 = vmul.f32 %v175_v32, %v168_v31 }
 0x130   :  { %874 = vmatmul.mubr.msk.f32.vlgmr.msra.gmra.mrb[0].mxu1 %vm177_vm2, %v176_v33 }
 0x131   :  { %975 = vmatpush3.bf16.msra.mxu1 %v972_v63  ;;  %v992_v63 = vpack.c.bf16 %v586_v62, %v585_v61 }
 0x132   :  { %977 = vmatprep.subr.bf16.mxu1 %v976_v5 }
 0x135   :  { %979 = vmatpush3.bf16.msra.mxu1 %v976_v5 }
 0x203   :  { %v247_v35 = vpop.f32.mrb[0].mxu1 }
 0x204   :  { %v248_v36 = vadd.f32 %v247_v35, %v93_v34  ;;  %v875_v37 = vpop.f32.mrb[1].mxu1 }
 0x206   :  { %v252_v38 = vrot.slane %v248_v36, 7  ;;  %v256_v39 = vrot.slane %v248_v36, 6 }
 0x208   :  { %253 = vrot.lane.b32.xlu0 %v252_v38, %s1135_s12 }
 0x20c   :  { %257 = vrot.lane.b32.xlu0 %v256_v39, %s1136_s13 }
 0x27a   :  { %v254_v40 = vpop.permute.xlu0 %253 }
 0x27b   :  { %v261_v41 = vsel %vm260_vm3, %v248_v36, %v254_v40 }
 0x27e   :  { %v258_v42 = vpop.permute.xlu0 %257 }
 0x27f   :  { %v1281_v43 = vsel %vm262_vm4, %v261_v41, %v258_v42 }
 0x280   :  { %885 = vmatmul.mubr.msk.f32.vlgmr.msra.gmra.mrb[2].mxu0 %vm94_vm1, %v1281_v43  ;;  %756 = vst.msk [vmem:[#allocation8] sm:$0x7] %vm755_vm5, %v1281_v43  ;;  %v467_v29 = vrot.slane %v1281_v43, 7 }
 0x281   :  { %962 = vmatpush3.bf16.msra.mxu0 %v943_v12  ;;  %903 = vmatprep.mubr.msk.f32.mxu0 %vm1133_vm0, %v1134_v1 }
 0x282   :  { %963 = vmatprep.subr.bf16.mxu0 %v1132_v0  ;;  %v475_v38 = vsel %vm260_vm3, %v1255_v8, %v467_v29 }
 0x285   :  { %965 = vmatpush3.bf16.msra.mxu0 %v946_v14  ;;  %v695_v14 = vsel %vm94_vm1, %v75_v13, 0.0 }
 0x286   :  { %966 = vmatprep.subr.bf16.mxu0 %v1132_v0  ;;  %v696_v15 = vrot.slane %v695_v14, 4 }
 0x288   :  { %v697_v16 = vadd.f32 %v696_v15, %v695_v14 }
 0x289   :  { %968 = vmatpush3.bf16.msra.mxu0 %v949_v17 }
 0x28a   :  { %969 = vmatprep.subr.bf16.mxu0 %v1132_v0  ;;  %v698_v17 = vrot.slane %v697_v16, 2 }
 0x28c   :  { %v699_v19 = vadd.f32 %v698_v17, %v697_v16 }
 0x28d   :  { %971 = vmatpush3.bf16.msra.mxu0 %v952_v20 }
 0x28e   :  { %v700_v25 = vrot.slane %v699_v19, 1 }
 0x290   :  { %v701_v31 = vadd.f32 %v700_v25, %v699_v19 }
 0x292   :  { %v703_v39 = vmul.f32 0.125, %v701_v31 }
 0x294   :  { %v737_v43 = vmul.f32 %v703_v39, %v703_v39 }
 0x296   :  { %v738_v8 = vsel %vm94_vm1, %v737_v43, 0.0 }
 0x353   :  { %v337_v48 = vpop.f32.mrb[2].mxu0 }
 0x354   :  { %v338_v49 = vadd.f32 %v337_v48, %v267_v47  ;;  %v886_v50 = vpop.f32.mrb[3].mxu0 }
 0x356   :  { %v342_v51 = vmul.f32 0.044715, %v338_v49  ;;  %v341_v57 = vmul.f32 0.5, %v338_v49 }
 0x358   :  { %v343_v52 = vmul.f32 %v342_v51, %v338_v49 }
 0x35a   :  { %v344_v53 = vmul.f32 %v343_v52, %v338_v49  ;;  %v579_v52 = vld [vmem:[#allocation7] sm:$0xff] }
 0x35c   :  { %v345_v54 = vadd.f32 %v344_v53, %v338_v49  ;;  %v580_v53 = vld [vmem:[#allocation7 + $0x8] sm:$0xff] }
 0x35e   :  { %v346_v55 = vmul.f32 0.7978846, %v345_v54  ;;  %v980_v54 = vpack.c.bf16 %v580_v53, %v579_v52 }
 0x360   :  { %1009 = vtanh.f32 %v346_v55  ;;  %v581_v55 = vld [vmem:[#allocation7 + $0x10] sm:$0xff]  ;;  %981 = vmatprep.subr.bf16.mxu1 %v980_v54 }
 0x36a   :  { %v1010_v56 = vpop.eup %1009 }
 0x36b   :  { %v348_v58 = vadd.f32 1.0, %v1010_v56  ;;  %v582_v56 = vld [vmem:[#allocation7 + $0x18] sm:$0xff] }
 0x36d   :  { %v349_v59 = vmul.f32 %v348_v58, %v341_v57  ;;  %v984_v57 = vpack.c.bf16 %v582_v56, %v581_v55  ;;  %v583_v58 = vld [vmem:[#allocation7 + $0x20] sm:$0xff] }
 0x36f   :  { %904 = vmatmul.mubr.msk.f32.vlgmr.msra.gmra.mrb[4].mxu0 %vm177_vm2, %v349_v59  ;;  %v584_v59 = vld [vmem:[#allocation7 + $0x28] sm:$0xff] }
 0x442   :  { %v425_v0 = vpop.f32.mrb[4].mxu0 }
 0x443   :  { %v426_v1 = vadd.f32 %v425_v0, %v354_v60  ;;  %v905_v2 = vpop.f32.mrb[5].mxu0  ;;  %v988_v60 = vpack.c.bf16 %v584_v59, %v583_v58  ;;  %v479_v0 = vsub.s32 1, %v1291_v45 }
 0x445   :  { %758 = vst.msk [vmem:[%s1356_s9] sm:$0x7] %vm757_vm6, %v426_v1  ;;  %v439_v6 = vrot.slane %v426_v1, 5  ;;  %v430_v7 = vrot.slane %v426_v1, 7  ;;  %v448_v9 = vrot.slane %v426_v1, 3  ;;  %v434_v10 = vrot.slane %v426_v1, 6 }
 0x446   :  { %v443_v11 = vrot.slane %v426_v1, 4  ;;  %v452_v12 = vrot.slane %v426_v1, 2 }
 0x447   :  { %440 = vrot.lane.b32.xlu0 %v439_v6, %s1135_s12  ;;  %431 = vrot.lane.b32.xlu1 %v430_v7, %s1135_s12 }
 0x44b   :  { %449 = vrot.lane.b32.xlu0 %v448_v9, %s1135_s12  ;;  %435 = vrot.lane.b32.xlu1 %v434_v10, %s1136_s13 }
 0x44f   :  { %444 = vrot.lane.b32.xlu1 %v443_v11, %s1136_s13 }
 0x453   :  { %453 = vrot.lane.b32.xlu1 %v452_v12, %s1136_s13 }
 0x4b9   :  { %v432_v18 = vpop.permute.xlu1 %431  ;;  %v441_v20 = vpop.permute.xlu0 %440 }
 0x4ba   :  { %v455_v22 = vsel %vm260_vm3, %v426_v1, %v432_v18  ;;  %v480_v1 = vrot.slane %v1270_v21, %v479_v0 }
 0x4bd   :  { %v436_v23 = vpop.permute.xlu1 %435  ;;  %v450_v32 = vpop.permute.xlu0 %449 }
 0x4be   :  { %v456_v24 = vsel %vm262_vm4, %v455_v22, %v436_v23 }
 0x4bf   :  { %v458_v26 = vsel %vm457_vm7, %v456_v24, %v434_v10 }
 0x4c0   :  { %v460_v27 = vsel %vm459_vm8, %v458_v26, %v441_v20 }
 0x4c1   :  { %v445_v28 = vpop.permute.xlu1 %444 }
 0x4c2   :  { %v462_v30 = vsel %vm461_vm9, %v460_v27, %v445_v28 }
 0x4c3   :  { %v464_v33 = vsel %vm463_vm10, %v462_v30, %v443_v11 }
 0x4c4   :  { %v466_v34 = vsel %vm465_vm11, %v464_v33, %v450_v32 }
 0x4c5   :  { %v470_v35 = vrot.slane %v466_v34, 4  ;;  %v454_v36 = vpop.permute.xlu1 %453 }
 0x4c6   :  { %v471_v37 = vrot.slane %v454_v36, 4 }
 0x4c7   :  { %v476_v40 = vsel %vm459_vm8, %v475_v38, %v470_v35 }
 0x4c8   :  { %v472_v41 = vsel %vm459_vm8, %v470_v35, %v471_v37  ;;  %914 = vmatprep.mubr.msk.f32.mxu1 %vm94_vm1, %v476_v40  ;;  %v713_v42 = vmul.f32 %v476_v40, %v476_v40  ;;  %v704_v49 = vmul.f32 %v703_v39, %v476_v40 }
 0x4c9   :  { %915 = vmatmul.mubr.msk.f32.vlgmr.msra.gmra.mrb[2].mxu1 %vm94_vm1, %v472_v41  ;;  %v714_v44 = vmul.f32 %v472_v41, %v472_v41  ;;  %v705_v48 = vmul.f32 %v703_v39, %v472_v41 }
 0x4ca   :  { %v715_v46 = vsel %vm94_vm1, %v713_v42, 0.0  ;;  %v706_v51 = vsel %vm94_vm1, %v704_v49, 0.0  ;;  %983 = vmatpush3.bf16.msra.mxu1 %v980_v54 }
 0x4cb   :  { %716 = vadd.xlane.f32.xlu0 %v715_v46  ;;  %v718_v47 = vsel %vm709_vm12, %v714_v44, 0.0  ;;  %v710_v50 = vsel %vm709_vm12, %v705_v48, 0.0  ;;  %985 = vmatprep.subr.bf16.mxu1 %v984_v57 }
 0x4cc   :  { %719 = vadd.xlane.f32.xlu1 %v718_v47 }
 0x4ce   :  { %987 = vmatpush3.bf16.msra.mxu1 %v984_v57 }
 0x4cf   :  { %739 = vadd.xlane.f32.xlu0 %v738_v8  ;;  %989 = vmatprep.subr.bf16.mxu1 %v988_v60 }
 0x4d0   :  { %711 = vadd.xlane.f32.xlu1 %v710_v50 }
 0x4d2   :  { %991 = vmatpush3.bf16.msra.mxu1 %v988_v60 }
 0x4d3   :  { %707 = vadd.xlane.f32.xlu0 %v706_v51  ;;  %993 = vmatprep.subr.bf16.mxu1 %v992_v63 }
 0x4d6   :  { %995 = vmatpush3.bf16.msra.mxu1 %v992_v63 }
 0x59c   :  { %v916_v2 = vpop.f32.mrb[2].mxu1 }
 0x59d   :  { %v558_v3 = vadd.f32 %v916_v2, %v480_v1  ;;  %v552_v4 = vpop.f32.mrb[3].mxu1 }
 0x59e   :  { %v553_v5 = vadd.f32 %v552_v4, %v480_v1 }
 0x59f   :  { %v564_v6 = vmul.f32 0.044715, %v558_v3  ;;  %v562_v20 = vmul.f32 0.5, %v558_v3 }
 0x5a0   :  { %v563_v7 = vmul.f32 0.044715, %v553_v5  ;;  %v561_v21 = vmul.f32 0.5, %v553_v5 }
 0x5a1   :  { %v566_v9 = vmul.f32 %v564_v6, %v558_v3 }
 0x5a2   :  { %v565_v10 = vmul.f32 %v563_v7, %v553_v5 }
 0x5a3   :  { %v568_v11 = vmul.f32 %v566_v9, %v558_v3 }
 0x5a4   :  { %v567_v12 = vmul.f32 %v565_v10, %v553_v5 }
 0x5a5   :  { %v570_v13 = vadd.f32 %v568_v11, %v558_v3 }
 0x5a6   :  { %v569_v14 = vadd.f32 %v567_v12, %v553_v5 }
 0x5a7   :  { %v572_v15 = vmul.f32 0.7978846, %v570_v13 }
 0x5a8   :  { %v571_v16 = vmul.f32 0.7978846, %v569_v14 }
 0x5a9   :  { %1011 = vtanh.f32 %v572_v15 }
 0x5aa   :  { %1013 = vtanh.f32 %v571_v16 }
 0x5b3   :  { %v1012_v17 = vpop.eup %1011 }
 0x5b4   :  { %v1014_v45 = vpop.eup %1013  ;;  %v576_v18 = vadd.f32 1.0, %v1012_v17 }
 0x5b5   :  { %v575_v19 = vadd.f32 1.0, %v1014_v45 }
 0x5b6   :  { %v578_v23 = vmul.f32 %v576_v18, %v562_v20 }
 0x5b7   :  { %v577_v22 = vmul.f32 %v575_v19, %v561_v21 }
 0x5b9   :  { %933 = vmatprep.mubr.msk.f32.mxu1 %vm177_vm2, %v577_v22 }
 0x5ba   :  { %934 = vmatmul.mubr.msk.f32.vlgmr.msra.gmra.mrb[4].mxu1 %vm177_vm2, %v578_v23 }
 0x5bb   :  { %1110 = shalt.err (!%p1107_p0)
}
 0x5bc   :  { %s1111_s20 = scalar_lea.hbm %s1355_s8, 64 }
 0x5bd   :  { %p1112_p1 = scmp.ne.s32.totalorder %s1355_s8, %s1111_s20  ;;  %p1115_p2 = scmp.lt.u32.totalorder %s1111_s20, %s1355_s8 }
 0x5bf   :  { %p1117_p3 = pnand %p1115_p2, %p1112_p1 }
 0x5c1   :  { %1120 = shalt.err (!%p1117_p3)
}
 0x5c2   :  { %778 = dma.vmem_to_hbm [thread:$0]  %s776_s18, 64, %s1355_s8, [#allocation4]   ;;  %v717_v24 = vpop.xlane.xlu0 %716  ;;  %v720_v26 = vpop.xlane.xlu1 %719  ;;  %v799_v27 = vld [vmem:[%s1354_s7] ss:$0 sm:$0xff]  ;;  %vm759_vm3 = vcmask 7168   ;;  %vm762_vm5 = vcmask 15360  }
 0x5c3   :  { %vm730_vm15 = vcmp.eq.f32.partialorder %v720_v26, inf  ;;  %vm723_vm0 = vcmp.eq.f32.partialorder %v717_v24, inf  ;;  %v733_v8 = vand.u32 2147483648, %v720_v26  ;;  %v726_v50 = vand.u32 2147483648, %v717_v24 }
 0x5c4   :  { %vm732_vm1 = vcmp.eq.f32.partialorder %v720_v26, 0.0  ;;  %vm725_vm2 = vcmp.eq.f32.partialorder %v717_v24, 0.0  ;;  %vm767_vm6 = vcmask 20480   ;;  %vm765_vm8 = vcmask 23552  }
 0x5c6   :  { %v740_v25 = vpop.xlane.xlu0 %739  ;;  %v712_v3 = vpop.xlane.xlu1 %711 }
 0x5c7   :  { %1015 = vrsqrt.f32 %v740_v25  ;;  %vm743_vm13 = vcmp.eq.f32.partialorder %v740_v25, inf  ;;  %v746_v40 = vand.u32 2147483648, %v740_v25  ;;  %vm745_vm14 = vcmp.eq.f32.partialorder %v740_v25, 0.0 }
 0x5c8   :  { %1017 = vrsqrt.f32 %v720_v26 }
 0x5c9   :  { %1019 = vrsqrt.f32 %v717_v24 }
 0x5ca   :  { %v708_v6 = vpop.xlane.xlu0 %707 }
 0x5d1   :  { %v1016_v28 = vpop.eup %1015 }
 0x5d2   :  { %v1018_v30 = vpop.eup %1017  ;;  %v742_v34 = vmul.f32 %v1016_v28, %v740_v25 }
 0x5d3   :  { %v1020_v33 = vpop.eup %1019  ;;  %v729_v37 = vmul.f32 %v1018_v30, %v720_v26 }
 0x5d4   :  { %v722_v39 = vmul.f32 %v1020_v33, %v717_v24  ;;  %v744_v42 = vsel %vm743_vm13, %v740_v25, %v742_v34 }
 0x5d5   :  { %v731_v46 = vsel %vm730_vm15, %v720_v26, %v729_v37  ;;  %v747_v49 = vsel %vm745_vm14, %v746_v40, %v744_v42 }
 0x5d6   :  { %v724_v48 = vsel %vm723_vm0, %v717_v24, %v722_v39  ;;  %v734_v51 = vsel %vm732_vm1, %v733_v8, %v731_v46  ;;  %v748_v53 = vmax.f32 %v747_v49, 1e-08 }
 0x5d7   :  { %v727_v52 = vsel %vm725_vm2, %v726_v50, %v724_v48  ;;  %v736_v54 = vmax.f32 %v734_v51, 1e-08 }
 0x5d8   :  { %v735_v55 = vmax.f32 %v727_v52, 1e-08 }
 0x5d9   :  { %v750_v56 = vmul.f32 %v748_v53, %v736_v54 }
 0x5da   :  { %v749_v57 = vmul.f32 %v748_v53, %v735_v55 }
 0x68d   :  { %v935_v29 = vpop.f32.mrb[4].mxu1 }
 0x68e   :  { %v672_v31 = vadd.f32 %v935_v29, %v799_v27  ;;  %v666_v32 = vpop.f32.mrb[5].mxu1 }
 0x68f   :  { %v667_v35 = vadd.f32 %v799_v27, %v666_v32 }
 0x690   :  { %v676_v36 = vand.u32 2147483647, %v672_v31  ;;  %vm684_vm4 = vcmp.ge.f32.partialorder %v672_v31, 0.0 }
 0x691   :  { %v675_v38 = vand.u32 2147483647, %v667_v35  ;;  %vm683_vm7 = vcmp.ge.f32.partialorder %v667_v35, 0.0 }
 0x692   :  { %v678_v41 = vsub.f32 0.0, %v676_v36 }
 0x693   :  { %v677_v43 = vsub.f32 0.0, %v675_v38 }
 0x694   :  { %v681_v44 = vmul.f32 1.442695, %v678_v41 }
 0x695   :  { %v679_v47 = vmul.f32 1.442695, %v677_v43 }
 0x696   :  { %1021 = vpow2.f32 %v681_v44 }
 0x697   :  { %1023 = vpow2.f32 %v679_v47 }
 0x698   :  { %1025 = vrcp.f32 %v750_v56 }
 0x699   :  { %1027 = vrcp.f32 %v749_v57 }
 0x6a0   :  { %v1022_v58 = vpop.eup %1021 }
 0x6a1   :  { %v1024_v59 = vpop.eup %1023  ;;  %v686_v60 = vadd.f32 1.0, %v1022_v58 }
 0x6a2   :  { %v685_v61 = vadd.f32 1.0, %v1024_v59  ;;  %v1026_v62 = vpop.eup %1025 }
 0x6a3   :  { %1029 = vrcp.f32 %v686_v60  ;;  %v1028_v63 = vpop.eup %1027  ;;  %v754_v5 = vmul.f32 %v1026_v62, %v712_v3 }
 0x6a4   :  { %1031 = vrcp.f32 %v685_v61  ;;  %v752_v9 = vmul.f32 %v1028_v63, %v708_v6 }
 0x6ad   :  { %v1030_v0 = vpop.eup %1029 }
 0x6ae   :  { %v1032_v1 = vpop.eup %1031  ;;  %v692_v2 = vmul.f32 %v1030_v0, %v1022_v58 }
 0x6af   :  { %v691_v4 = vmul.f32 %v1032_v1, %v1024_v59 }
 0x6b0   :  { %v694_v7 = vsel %vm684_vm4, %v1030_v0, %v692_v2 }
 0x6b1   :  { %v761_v10 = vsel %vm759_vm3, %v694_v7, %v672_v31  ;;  %v693_v11 = vsel %vm683_vm7, %v1032_v1, %v691_v4 }
 0x6b2   :  { %v764_v12 = vsel %vm762_vm5, %v761_v10, %v754_v5  ;;  %v760_v13 = vsel %vm759_vm3, %v693_v11, %v667_v35 }
 0x6b3   :  { %768 = vst.msk [vmem:[%s1357_s10 + $0x8] sm:$0x1f] %vm767_vm6, %v764_v12  ;;  %v763_v14 = vsel %vm762_vm5, %v760_v13, %v752_v9 }
 0x6b4   :  { %766 = vst.msk [vmem:[%s1357_s10] sm:$0xff] %vm765_vm8, %v763_v14 }
 0x6b5   :  { %1125 = dma.done.wait [#allocation4], 64  }
 0x6b6   :  { %1126 = vsyncadd [#allocation4], 4294967232 }
 0x6b7   :  { %790 = vsyncpa [#allocation3], 1 }
 0x6b8   :  { %791 = vsyncpa [#allocation6], 1 }
 0x6b9   :  { %792 = vsyncpa [#allocation4], 1 }

</bundles_post_ra>
